<compile_context>
chip_gen: v5e
topology: v5e:2x2
jax: 0.10.0
libtpu: 0.0.40
codegen_flags: <defaults>
</compile_context>

<pallas_src>
import functools

import jax
import jax.numpy as jnp
from jax.experimental import pallas as pl
from jax.experimental.pallas import tpu as pltpu


_EPS = 1e-6                   # LayerNorm eps (backbone blocks + module norms)
_NEG_BIG = 1e30               # finite additive key mask (avoids -inf - -inf NaNs)
_MM_DTYPE = jnp.bfloat16      # MXU operand dtype; accumulation stays f32
_VMEM_LIMIT = 64 * 1024 * 1024


# ----------------------------------------------------------------------------
# Small helpers
# ----------------------------------------------------------------------------
def _wspec(shape):
    """Resident (untiled) weight block: same block index at every grid step."""
    return pl.BlockSpec(shape, lambda b: (0, 0))


def _ln(x, g, b, eps=_EPS):
    """LayerNorm over the last axis, f32 elementwise math."""
    mu = jnp.mean(x, axis=-1, keepdims=True)
    xc = x - mu
    var = jnp.mean(xc * xc, axis=-1, keepdims=True)
    return xc * jax.lax.rsqrt(var + eps) * g + b


def _mm(a, w_ref):
    """MXU matmul: bf16 operands, f32 accumulation."""
    w = w_ref[...]
    return jnp.dot(a.astype(w.dtype), w, preferred_element_type=jnp.float32)


# ----------------------------------------------------------------------------
# Shared transformer-block body (traced inline by both fused kernels)
# ----------------------------------------------------------------------------
def _transformer_block(x, wrefs, attn_ref, *, num_heads, key_bias=None, qmask=None):
    """One ViT block on a single batch's (N, D) slab.

    key_bias: optional (1, N) additive bias (0 kept / -1e30 pruned keys).
    qmask:    optional (N, 1) {0,1} mask zeroing masked-query attention rows
              (matches the reference's attn.masked_fill(~mask, 0.0)).
    """
    (n1g, n1b, qkvw, qkvb, projw, projb,
     n2g, n2b, fc1w, fc1b, fc2w, fc2b) = wrefs
    n, d = x.shape
    dh = d // num_heads
    scale = dh ** -0.5
    use_mxu = n > 8            # VPU broadcast path only for the toy N<=8 case

    # --- LayerNorm1 + fused QKV ----------------------------------------------
    xn1 = _ln(x, n1g[...], n1b[...])
    qkv = _mm(xn1, qkvw) + qkvb[...]
    q = qkv[:, 0:d] * scale            # softmax scale folded into Q
    k = qkv[:, d:2 * d]
    v = qkv[:, 2 * d:3 * d]

    # --- multi-head attention; each head writes its own column strip ---------
    # TODO(synk): at large head counts make the head loop a grid axis as well.
    for h in range(num_heads):
        c0 = h * dh
        qh = q[:, c0:c0 + dh]
        kh = k[:, c0:c0 + dh]
        vh = v[:, c0:c0 + dh]
        if use_mxu:
            s = jax.lax.dot_general(
                qh.astype(_MM_DTYPE), kh.astype(_MM_DTYPE),
                (((1,), (1,)), ((), ())), preferred_element_type=jnp.float32)
        else:
            s = jnp.sum(qh[:, None, :] * kh[None, :, :], axis=-1)
        if key_bias is not None:
            s = s + key_bias
        smax = jnp.max(s, axis=-1, keepdims=True)
        p = jnp.exp(s - smax)
        p = p / jnp.sum(p, axis=-1, keepdims=True)     # exact divide
        if use_mxu:
            oh = jnp.dot(p.astype(_MM_DTYPE), vh.astype(_MM_DTYPE),
                         preferred_element_type=jnp.float32)
        else:
            oh = jnp.sum(p[:, :, None] * vh[None, :, :], axis=1)
        if qmask is not None:
            oh = oh * qmask                            # zero masked-query rows
        attn_ref[:, c0:c0 + dh] = oh                   # direct column-strip store

    # --- proj + residual + MLP + residual -------------------------------------
    y = _mm(attn_ref[...], projw) + projb[...]
    x1 = x + y                                          # drop_path = id in eval
    xn2 = _ln(x1, n2g[...], n2b[...])
    h1 = _mm(xn2, fc1w) + fc1b[...]
    h1 = jax.nn.gelu(h1, approximate=False)             # exact (erf) GELU
    h2 = _mm(h1, fc2w) + fc2b[...]
    return x1 + h2


# ----------------------------------------------------------------------------
# Kernel 1: transformer block + fused TIME head (scored blocks)
# ----------------------------------------------------------------------------
# TODO(synk): Token_Importance_Measurer source was not provided; a synthetic
# CLS-query attention scorer + linear classification head is used here.
def _block_time_kernel(x_ref,
                       n1g, n1b, qkvw, qkvb, projw, projb,
                       n2g, n2b, fc1w, fc1b, fc2w, fc2b,
                       tng, tnb, tqw, tqb, tkw, tkb, thw, thb,
                       xo_ref, score_ref, pred_ref, attn_ref, *, num_heads):
    x = x_ref[...]                                      # (N, D) for this batch
    wrefs = (n1g, n1b, qkvw, qkvb, projw, projb,
             n2g, n2b, fc1w, fc1b, fc2w, fc2b)
    xo = _transformer_block(x, wrefs, attn_ref, num_heads=num_heads)
    xo_ref[...] = xo

    # Fused TIME head (x.detach() in the reference is a forward no-op).
    d = xo.shape[-1]
    xn = _ln(xo, tng[...], tnb[...])
    cls = xn[0:1, :]                                    # CLS row, static slice
    kproj = _mm(xn, tkw) + tkb[...]                     # (N, D)
    qproj = _mm(cls, tqw) + tqb[...]                    # (1, D)
    score = jax.lax.dot_general(
        qproj.astype(_MM_DTYPE), kproj.astype(_MM_DTYPE),
        (((1,), (1,)), ((), ())), preferred_element_type=jnp.float32)
    score_ref[...] = score * (d ** -0.5)                # (1, N)
    pred_ref[...] = _mm(cls, thw) + thb[...]            # (1, num_classes)


def block_time_forward(x, bp, tp, *, num_heads):
    B, N, D = x.shape
    nc = tp["head_b"].shape[0]
    w = _prep_block_weights(bp)
    tw = _prep_time_weights(tp)
    kern = functools.partial(_block_time_kernel, num_heads=num_heads)
    act_spec = pl.BlockSpec((None, N, D), lambda b: (b, 0, 0))
    xo, score, pred = pl.pallas_call(
        kern,
        grid=(B,),
        out_shape=(jax.ShapeDtypeStruct((B, N, D), jnp.float32),
                   jax.ShapeDtypeStruct((B, 1, N), jnp.float32),
                   jax.ShapeDtypeStruct((B, 1, nc), jnp.float32)),
        in_specs=[act_spec] + [_wspec(a.shape) for a in (w + tw)],
        out_specs=(act_spec,
                   pl.BlockSpec((None, 1, N), lambda b: (b, 0, 0)),
                   pl.BlockSpec((None, 1, nc), lambda b: (b, 0, 0))),
        scratch_shapes=[pltpu.VMEM((N, D), jnp.float32)],
        compiler_params=pltpu.CompilerParams(
            dimension_semantics=("parallel",),
            vmem_limit_bytes=_VMEM_LIMIT),
    )(x, *w, *tw)
    return xo, score.reshape(B, N), pred.reshape(B, nc)


# ----------------------------------------------------------------------------
# Kernel 2: masked transformer block + backbone norm + masked pool + final norm
# ----------------------------------------------------------------------------
def _block_pool_kernel(x_ref, mrow_ref, mcol_ref,
                       n1g, n1b, qkvw, qkvb, projw, projb,
                       n2g, n2b, fc1w, fc1b, fc2w, fc2b,
                       bng, bnb, fng, fnb,
                       o_ref, attn_ref, *, num_heads):
    x = x_ref[...]                                      # (N, D)
    mrow = mrow_ref[...]                                # (1, N) keep mask
    mcol = mcol_ref[...]                                # (N, 1) keep mask
    key_bias = (mrow - 1.0) * _NEG_BIG                  # 0 kept / -1e30 pruned keys
    wrefs = (n1g, n1b, qkvw, qkvb, projw, projb,
             n2g, n2b, fc1w, fc1b, fc2w, fc2b)
    xo = _transformer_block(x, wrefs, attn_ref, num_heads=num_heads,
                            key_bias=key_bias, qmask=mcol)

    # backbone norm -> masked mean-pool -> final LayerNorm (all fused, per batch)
    xbn = _ln(xo, bng[...], bnb[...])
    num = jnp.sum(mcol * xbn, axis=0, keepdims=True)    # (1, D)
    den = jnp.sum(mrow, axis=-1, keepdims=True)         # (1, 1), >= 1 (CLS kept)
    pooled = num / den                                  # exact divide
    o_ref[...] = _ln(pooled, fng[...], fnb[...])


def block_pool_forward(x, mask, bp, params, *, num_heads):
    B, N, D = x.shape
    w = _prep_block_weights(bp)
    extra = [params["backbone_norm_g"].reshape(1, -1),
             params["backbone_norm_b"].reshape(1, -1),
             params["norm_g"].reshape(1, -1),
             params["norm_b"].reshape(1, -1)]
    mrow = mask.reshape(B, 1, N)
    mcol = mask.reshape(B, N, 1)
    kern = functools.partial(_block_pool_kernel, num_heads=num_heads)
    out = pl.pallas_call(
        kern,
        grid=(B,),
        out_shape=jax.ShapeDtypeStruct((B, 1, D), jnp.float32),
        in_specs=([pl.BlockSpec((None, N, D), lambda b: (b, 0, 0)),
                   pl.BlockSpec((None, 1, N), lambda b: (b, 0, 0)),
                   pl.BlockSpec((None, N, 1), lambda b: (b, 0, 0))]
                  + [_wspec(a.shape) for a in (w + extra)]),
        out_specs=pl.BlockSpec((None, 1, D), lambda b: (b, 0, 0)),
        scratch_shapes=[pltpu.VMEM((N, D), jnp.float32)],
        compiler_params=pltpu.CompilerParams(
            dimension_semantics=("parallel",),
            vmem_limit_bytes=_VMEM_LIMIT),
    )(x, mrow, mcol, *w, *extra)
    return out.reshape(B, D)


# ----------------------------------------------------------------------------
# Kernel 3: plain linear (16x16 patch embedding)
# ----------------------------------------------------------------------------
def _linear_kernel(x_ref, w_ref, b_ref, o_ref):
    w = w_ref[...]
    o_ref[...] = jnp.dot(x_ref[...].astype(w.dtype), w,
                         preferred_element_type=jnp.float32) + b_ref[...]


def linear(x2d, w, b):
    m, n = x2d.shape[0], w.shape[1]
    # TODO(synk): at production sizes, tile the row (M) dimension with a grid
    # and fuse the NCHW patchify relayout into this kernel via its index_map
    # instead of the XLA 6-D transpose in prepare_tokens.
    return pl.pallas_call(
        _linear_kernel,
        out_shape=jax.ShapeDtypeStruct((m, n), jnp.float32),
        in_specs=[pl.BlockSpec(memory_space=pltpu.MemorySpace.VMEM)] * 3,
        out_specs=pl.BlockSpec(memory_space=pltpu.MemorySpace.VMEM),
    )(x2d, w.astype(_MM_DTYPE), b.reshape(1, n).astype(jnp.float32))


# ----------------------------------------------------------------------------
# Weight packing (bf16 matmul operands, f32 biases / LN params)
# ----------------------------------------------------------------------------
def _prep_block_weights(p):
    return [
        p["norm1_g"].reshape(1, -1), p["norm1_b"].reshape(1, -1),
        p["qkv_w"].astype(_MM_DTYPE), p["qkv_b"].reshape(1, -1),
        p["proj_w"].astype(_MM_DTYPE), p["proj_b"].reshape(1, -1),
        p["norm2_g"].reshape(1, -1), p["norm2_b"].reshape(1, -1),
        p["fc1_w"].astype(_MM_DTYPE), p["fc1_b"].reshape(1, -1),
        p["fc2_w"].astype(_MM_DTYPE), p["fc2_b"].reshape(1, -1),
    ]


def _prep_time_weights(p):
    return [
        p["norm_g"].reshape(1, -1), p["norm_b"].reshape(1, -1),
        p["q_w"].astype(_MM_DTYPE), p["q_b"].reshape(1, -1),
        p["k_w"].astype(_MM_DTYPE), p["k_b"].reshape(1, -1),
        p["head_w"].astype(_MM_DTYPE), p["head_b"].reshape(1, -1),
    ]


# ----------------------------------------------------------------------------
# Glue: token preparation, prune, full forward
# ----------------------------------------------------------------------------
def prepare_tokens(imgs, params):
    """Patch-embed (16x16 conv as unfold+matmul), prepend CLS, add pos-embed."""
    b, c, h, w = imgs.shape
    ph = pw = 16
    nh, nw = h // ph, w // pw
    patches = imgs.reshape(b, c, nh, ph, nw, pw)
    patches = patches.transpose(0, 2, 4, 1, 3, 5).reshape(b * nh * nw, c * ph * pw)
    emb = linear(patches, params["patch_w"], params["patch_b"])       # (B*P, D)
    d = emb.shape[-1]
    emb = emb.reshape(b, nh * nw, d)
    cls = jnp.broadcast_to(params["cls_token"], (b, 1, d))
    x = jnp.concatenate([cls, emb], axis=1) + params["pos_embed"]     # (B, N, D)
    return x


def prune(scores, training, threshold, batch_size):
    """Sort/cumsum/scatter mask construction (plain JAX; no Pallas sort)."""
    patch_scores = jnp.stack([s[:, 1:] for s in scores], axis=1)       # (B, L, P)
    patch_scores = jax.nn.softmax(patch_scores, axis=-1).mean(axis=1)  # (B, P)
    order = jnp.argsort(patch_scores, axis=1)                          # ascending
    patch_sort = jnp.take_along_axis(patch_scores, order, axis=1)
    patch_cum = jnp.cumsum(patch_sort, axis=1)
    keep_sorted = patch_cum > threshold
    inv = jnp.argsort(order, axis=1)                                   # inverse perm
    patch_masks = jnp.take_along_axis(keep_sorted, inv, axis=1)
    if training:
        patch_masks = patch_masks.at[batch_size:].set(True)
    remain_token_num = jnp.sum(patch_masks[:batch_size])
    unit = jnp.ones((patch_masks.shape[0], 1), bool)
    token_masks = jnp.concatenate([unit, patch_masks], axis=1)         # (B, N)
    return token_masks, remain_token_num


def token_adaptive_pruner_forward(imgs, params, training=False):
    num_heads = params["num_heads"]
    x = prepare_tokens(imgs, params)                                   # (B, N, D)
    blocks = params["blocks"]

    preds, attn_scores = [], []
    for i in range(len(blocks) - 1):
        # Reference feeds x.detach() to TIME; stop_gradient is a forward no-op,
        # so the TIME head is fused into the same kernel as the block.
        x, score, pred = block_time_forward(x, blocks[i], params["time"][i],
                                            num_heads=num_heads)
        attn_scores.append(score)
        preds.append(pred)

    token_masks, _remain = prune(attn_scores, training,
                                 params["threshold"], params["batch_size"])
    out = block_pool_forward(x, token_masks.astype(jnp.float32), blocks[-1],
                             params, num_heads=num_heads)
    return out, preds


# ----------------------------------------------------------------------------
# Deterministic parameter init (synthetic weights)
# ----------------------------------------------------------------------------
def init_params(key, *, feat_dim=32, num_heads=4, num_blocks=3, num_classes=10,
                image_size=32, in_chans=3, mlp_ratio=4, threshold=0.3, batch_size=2):
    def nrm(k, shape, std=0.02):
        return std * jax.random.normal(k, shape, jnp.float32)

    hidden = mlp_ratio * feat_dim
    n_patches = (image_size // 16) ** 2
    n_tokens = n_patches + 1
    keys = iter(jax.random.split(key, 64))

    params = {
        "num_heads": num_heads,
        "threshold": threshold,
        "batch_size": batch_size,
        "patch_w": nrm(next(keys), (in_chans * 16 * 16, feat_dim)),
        "patch_b": jnp.zeros((feat_dim,), jnp.float32),
        "cls_token": nrm(next(keys), (1, 1, feat_dim)),
        "pos_embed": nrm(next(keys), (1, n_tokens, feat_dim)),
        "backbone_norm_g": jnp.ones((feat_dim,), jnp.float32),
        "backbone_norm_b": jnp.zeros((feat_dim,), jnp.float32),
        "norm_g": jnp.ones((feat_dim,), jnp.float32),
        "norm_b": jnp.zeros((feat_dim,), jnp.float32),
    }

    blocks = []
    for _ in range(num_blocks):
        blocks.append({
            "norm1_g": jnp.ones((feat_dim,), jnp.float32),
            "norm1_b": jnp.zeros((feat_dim,), jnp.float32),
            "qkv_w": nrm(next(keys), (feat_dim, 3 * feat_dim)),
            "qkv_b": jnp.zeros((3 * feat_dim,), jnp.float32),
            "proj_w": nrm(next(keys), (feat_dim, feat_dim)),
            "proj_b": jnp.zeros((feat_dim,), jnp.float32),
            "norm2_g": jnp.ones((feat_dim,), jnp.float32),
            "norm2_b": jnp.zeros((feat_dim,), jnp.float32),
            "fc1_w": nrm(next(keys), (feat_dim, hidden)),
            "fc1_b": jnp.zeros((hidden,), jnp.float32),
            "fc2_w": nrm(next(keys), (hidden, feat_dim)),
            "fc2_b": jnp.zeros((feat_dim,), jnp.float32),
        })
    params["blocks"] = blocks

    time_mods = []
    for _ in range(num_blocks - 1):
        time_mods.append({
            "norm_g": jnp.ones((feat_dim,), jnp.float32),
            "norm_b": jnp.zeros((feat_dim,), jnp.float32),
            "q_w": nrm(next(keys), (feat_dim, feat_dim)),
            "q_b": jnp.zeros((feat_dim,), jnp.float32),
            "k_w": nrm(next(keys), (feat_dim, feat_dim)),
            "k_b": jnp.zeros((feat_dim,), jnp.float32),
            "head_w": nrm(next(keys), (feat_dim, num_classes)),
            "head_b": jnp.zeros((num_classes,), jnp.float32),
        })
    params["time"] = time_mods
    return params


if __name__ == "__main__":
    key = jax.random.PRNGKey(0)
    pkey, xkey = jax.random.split(key)
    params = init_params(pkey, feat_dim=32, num_heads=4, num_blocks=3,
                         num_classes=10, image_size=32, batch_size=2)
    imgs = jax.random.normal(xkey, (2, 3, 32, 32), jnp.float32)   # NCHW

    feats, preds = token_adaptive_pruner_forward(imgs, params, training=False)
    feats = jax.block_until_ready(feats)
    for p in preds:
        jax.block_until_ready(p)

    assert feats.shape == (2, 32)
    assert all(p.shape == (2, 10) for p in preds)
    assert bool(jnp.all(jnp.isfinite(feats)))
    print("KERNEL_OK")
</pallas_src>

<mosaic_0001>
module attributes {stable_mosaic.version = 11 : i64} {
  func.func @_linear_kernel(%arg0: memref<8x768xf32, #tpu.memory_space<vmem>>, %arg1: memref<768x32xbf16, #tpu.memory_space<vmem>>, %arg2: memref<1x32xf32, #tpu.memory_space<vmem>>, %arg3: memref<8x32xf32, #tpu.memory_space<vmem>>) attributes {dimension_semantics = [], scalar_prefetch = 0 : i64, scratch_operands = 0 : i64, tpu.core_type = #tpu.core_type<tc>} {
    %c0 = arith.constant 0 : index
    %c0_0 = arith.constant 0 : index
    %0 = vector.load %arg1[%c0, %c0_0] : memref<768x32xbf16, #tpu.memory_space<vmem>>, vector<768x32xbf16>
    %c0_1 = arith.constant 0 : index
    %c0_2 = arith.constant 0 : index
    %1 = vector.load %arg0[%c0_1, %c0_2] : memref<8x768xf32, #tpu.memory_space<vmem>>, vector<8x768xf32>
    %2 = arith.truncf %1 : vector<8x768xf32> to vector<8x768xbf16>
    %cst = arith.constant dense<0.000000e+00> : vector<8x32xf32>
    %3 = tpu.matmul %2, %0, %cst {dimension_numbers = #tpu.dot_dimension_numbers<[1], [0], [0], [1], [0, 0, 1, 1], [], []>} : vector<8x768xbf16>, vector<768x32xbf16>, vector<8x32xf32> -> vector<8x32xf32>
    %c0_3 = arith.constant 0 : index
    %c0_4 = arith.constant 0 : index
    %4 = vector.load %arg2[%c0_3, %c0_4] : memref<1x32xf32, #tpu.memory_space<vmem>>, vector<1x32xf32>
    %5 = vector.broadcast %4 : vector<1x32xf32> to vector<8x32xf32>
    %6 = arith.addf %3, %5 : vector<8x32xf32>
    %c0_5 = arith.constant 0 : index
    %c0_6 = arith.constant 0 : index
    %7 = vector.load %arg3[%c0_5, %c0_6] : memref<8x32xf32, #tpu.memory_space<vmem>>, vector<8x32xf32>
    tpu.vector_store %arg3[%c0_5, %c0_6], %6 {strides = array<i32>} : memref<8x32xf32, #tpu.memory_space<vmem>>, vector<8x32xf32>,
    return
  }
}

</mosaic_0001>

<bundles_post_ra>
// kernel: tpu_custom_call.1
= control target key start
LH: loop header
LB: loop body
LE: loop exit
PB: predicated region body
PF: predicated region fallthrough
CT: control target
= control target key end

     0   :  { %s968_s0 = inlined_call_operand.vmem [shape: f32[8,768], index: 0, kind: input, shape index: {}]   ;;  %s969_s1 = inlined_call_operand.vmem [shape: bf16[768,32], index: 1, kind: input, shape index: {}]   ;;  %s970_s2 = inlined_call_operand.vmem [shape: f32[1,32], index: 2, kind: input, shape index: {}]   ;;  %s971_s3 = inlined_call_operand.hbm [shape: f32[8,32], index: 3, kind: output, shape index: {}]  }
   0x1   :  { %v710_v0 = vld [vmem:[%s969_s1 + $0x38] sm:$0xff]  ;;  %v709_v2 = vld [vmem:[%s969_s1 + $0x30] sm:$0xff]  ;;  %v708_v8 = vld [vmem:[%s969_s1 + $0x28] sm:$0xff] }
   0x2   :  { %v718_v1 = vld [vmem:[%s969_s1 + $0x78] sm:$0xff]  ;;  %415 = vmatpush.bf16.msra.mxu0 %v710_v0  ;;  %v717_v3 = vld [vmem:[%s969_s1 + $0x70] sm:$0xff]  ;;  %v716_v9 = vld [vmem:[%s969_s1 + $0x68] sm:$0xff] }
   0x3   :  { %428 = vmatpush.bf16.msra.mxu1 %v718_v1  ;;  %v726_v4 = vld [vmem:[%s969_s1 + $0xb8] sm:$0xff]  ;;  %v725_v6 = vld [vmem:[%s969_s1 + $0xb0] sm:$0xff]  ;;  %v724_v10 = vld [vmem:[%s969_s1 + $0xa8] sm:$0xff] }
   0x4   :  { %v734_v5 = vld [vmem:[%s969_s1 + $0xf8] sm:$0xff]  ;;  %441 = vmatpush.bf16.msra.mxu2 %v726_v4  ;;  %v733_v7 = vld [vmem:[%s969_s1 + $0xf0] sm:$0xff]  ;;  %v732_v11 = vld [vmem:[%s969_s1 + $0xe8] sm:$0xff] }
   0x5   :  { %454 = vmatpush.bf16.msra.mxu3 %v734_v5  ;;  %v707_v12 = vld [vmem:[%s969_s1 + $0x20] sm:$0xff]  ;;  %v706_v16 = vld [vmem:[%s969_s1 + $0x18] sm:$0xff] }
   0x6   :  { %416 = vmatpush.bf16.msra.mxu0 %v709_v2  ;;  %v715_v13 = vld [vmem:[%s969_s1 + $0x60] sm:$0xff]  ;;  %v714_v17 = vld [vmem:[%s969_s1 + $0x58] sm:$0xff] }
   0x7   :  { %429 = vmatpush.bf16.msra.mxu1 %v717_v3  ;;  %v723_v14 = vld [vmem:[%s969_s1 + $0xa0] sm:$0xff]  ;;  %v722_v18 = vld [vmem:[%s969_s1 + $0x98] sm:$0xff] }
   0x8   :  { %442 = vmatpush.bf16.msra.mxu2 %v725_v6  ;;  %v731_v15 = vld [vmem:[%s969_s1 + $0xe0] sm:$0xff]  ;;  %v730_v19 = vld [vmem:[%s969_s1 + $0xd8] sm:$0xff] }
   0x9   :  { %455 = vmatpush.bf16.msra.mxu3 %v733_v7 }
   0xa   :  { %417 = vmatpush.bf16.msra.mxu0 %v708_v8 }
   0xb   :  { %430 = vmatpush.bf16.msra.mxu1 %v716_v9 }
   0xc   :  { %443 = vmatpush.bf16.msra.mxu2 %v724_v10 }
   0xd   :  { %456 = vmatpush.bf16.msra.mxu3 %v732_v11 }
   0xe   :  { %418 = vmatpush.bf16.msra.mxu0 %v707_v12 }
   0xf   :  { %431 = vmatpush.bf16.msra.mxu1 %v715_v13 }
  0x10   :  { %444 = vmatpush.bf16.msra.mxu2 %v723_v14 }
  0x11   :  { %457 = vmatpush.bf16.msra.mxu3 %v731_v15 }
  0x12   :  { %8 = vsyncpa [#allocation3], 0  ;;  %419 = vmatpush.bf16.msra.mxu0 %v706_v16  ;;  %v705_v20 = vld [vmem:[%s969_s1 + $0x10] sm:$0xff]  ;;  %v704_v24 = vld [vmem:[%s969_s1 + $0x8] sm:$0xff]  ;;  %s502_s16 = sshll.u32 %s971_s3, 4  ;;  %vm493_vm0 = vcmask 261120   ;;  %s503_s16 = int_to_ptr.hbm [resolvable:$true] %s502_s16 }
  0x13   :  { %432 = vmatpush.bf16.msra.mxu1 %v714_v17  ;;  %v713_v21 = vld [vmem:[%s969_s1 + $0x50] sm:$0xff]  ;;  %v712_v25 = vld [vmem:[%s969_s1 + $0x48] sm:$0xff]  ;;  %v703_v28 = vld [vmem:[%s969_s1] sm:$0xff] }
  0x14   :  { %445 = vmatpush.bf16.msra.mxu2 %v722_v18  ;;  %v721_v22 = vld [vmem:[%s969_s1 + $0x90] sm:$0xff]  ;;  %v720_v26 = vld [vmem:[%s969_s1 + $0x88] sm:$0xff]  ;;  %v711_v29 = vld [vmem:[%s969_s1 + $0x40] sm:$0xff] }
  0x15   :  { %458 = vmatpush.bf16.msra.mxu3 %v730_v19  ;;  %v729_v23 = vld [vmem:[%s969_s1 + $0xd0] sm:$0xff]  ;;  %v728_v27 = vld [vmem:[%s969_s1 + $0xc8] sm:$0xff]  ;;  %v111_v30 = vld [vmem:[%s968_s0] sm:$0xff] }
  0x16   :  { %420 = vmatpush.bf16.msra.mxu0 %v705_v20  ;;  %v112_v31 = vld [vmem:[%s968_s0 + $0x8] sm:$0xff]  ;;  %v742_v32 = vld [vmem:[%s969_s1 + $0x138] sm:$0xff]  ;;  %v719_v34 = vld [vmem:[%s969_s1 + $0x80] sm:$0xff]  ;;  %v117_v36 = vpack.c.bf16 %v111_v30, %v111_v30 }
  0x17   :  { %433 = vmatpush.bf16.msra.mxu1 %v713_v21  ;;  %v750_v33 = vld [vmem:[%s969_s1 + $0x178] sm:$0xff]  ;;  %v727_v35 = vld [vmem:[%s969_s1 + $0xc0] sm:$0xff]  ;;  %v118_v37 = vpack.c.bf16 %v112_v31, %v112_v31  ;;  %v113_v38 = vld [vmem:[%s968_s0 + $0x10] sm:$0xff] }
  0x18   :  { %446 = vmatpush.bf16.msra.mxu2 %v721_v22  ;;  %v114_v39 = vld [vmem:[%s968_s0 + $0x18] sm:$0xff]  ;;  %v741_v40 = vld [vmem:[%s969_s1 + $0x130] sm:$0xff]  ;;  %v119_v42 = vpack.c.bf16 %v113_v38, %v113_v38  ;;  %v740_v44 = vld [vmem:[%s969_s1 + $0x128] sm:$0xff] }
  0x19   :  { %459 = vmatpush.bf16.msra.mxu3 %v729_v23  ;;  %v749_v41 = vld [vmem:[%s969_s1 + $0x170] sm:$0xff]  ;;  %v120_v43 = vpack.c.bf16 %v114_v39, %v114_v39  ;;  %v748_v45 = vld [vmem:[%s969_s1 + $0x168] sm:$0xff]  ;;  %v739_v46 = vld [vmem:[%s969_s1 + $0x120] sm:$0xff] }
  0x1a   :  { %421 = vmatpush.bf16.msra.mxu0 %v704_v24  ;;  %v747_v47 = vld [vmem:[%s969_s1 + $0x160] sm:$0xff]  ;;  %v738_v48 = vld [vmem:[%s969_s1 + $0x118] sm:$0xff]  ;;  %v737_v50 = vld [vmem:[%s969_s1 + $0x110] sm:$0xff] }
  0x1b   :  { %434 = vmatpush.bf16.msra.mxu1 %v712_v25  ;;  %v746_v49 = vld [vmem:[%s969_s1 + $0x158] sm:$0xff]  ;;  %v745_v51 = vld [vmem:[%s969_s1 + $0x150] sm:$0xff]  ;;  %v736_v52 = vld [vmem:[%s969_s1 + $0x108] sm:$0xff] }
  0x1c   :  { %447 = vmatpush.bf16.msra.mxu2 %v720_v26  ;;  %v744_v53 = vld [vmem:[%s969_s1 + $0x148] sm:$0xff]  ;;  %v735_v54 = vld [vmem:[%s969_s1 + $0x100] sm:$0xff] }
  0x1d   :  { %460 = vmatpush.bf16.msra.mxu3 %v728_v27  ;;  %v743_v55 = vld [vmem:[%s969_s1 + $0x140] sm:$0xff]  ;;  %v116_v57 = vld [vmem:[%s968_s0 + $0x28] sm:$0xff] }
  0x1e   :  { %422 = vmatpush.bf16.msra.mxu0 %v703_v28  ;;  %v115_v56 = vld [vmem:[%s968_s0 + $0x20] sm:$0xff]  ;;  %v122_v59 = vpack.c.bf16 %v116_v57, %v116_v57  ;;  %s779_s0 = smov [#allocation2]  }
  0x1f   :  { %435 = vmatpush.bf16.msra.mxu1 %v711_v29  ;;  %v121_v58 = vpack.c.bf16 %v115_v56, %v115_v56  ;;  %v752_v2 = vld [vmem:[%s970_s2] ss:$0 sm:$0xff]  ;;  %s500_s13 = sshll.u32 %s779_s0, 4  ;;  %s501_s13 = int_to_ptr.vmem [resolvable:$true] %s500_s13 }
  0x20   :  { %448 = vmatpush.bf16.msra.mxu2 %v719_v34 }
  0x21   :  { %461 = vmatpush.bf16.msra.mxu3 %v727_v35  ;;  %423 = vmatmul.bf16.vlgmr.msra.gmra.mxu0 %v117_v36 }
  0x22   :  { %467 = vmatpush.bf16.msrb.mxu0 %v742_v32  ;;  %436 = vmatmul.bf16.vlgmr.msra.gmra.mxu1 %v118_v37 }
  0x23   :  { %480 = vmatpush.bf16.msrb.mxu1 %v750_v33  ;;  %449 = vmatmul.bf16.vlgmr.msra.gmra.mxu2 %v119_v42 }
  0x24   :  { %462 = vmatmul.bf16.vlgmr.msra.gmra.mxu3 %v120_v43 }
  0x26   :  { %468 = vmatpush.bf16.msrb.mxu0 %v741_v40 }
  0x27   :  { %481 = vmatpush.bf16.msrb.mxu1 %v749_v41 }
  0x2a   :  { %469 = vmatpush.bf16.msrb.mxu0 %v740_v44 }
  0x2b   :  { %482 = vmatpush.bf16.msrb.mxu1 %v748_v45 }
  0x2e   :  { %470 = vmatpush.bf16.msrb.mxu0 %v739_v46 }
  0x2f   :  { %483 = vmatpush.bf16.msrb.mxu1 %v747_v47 }
  0x32   :  { %471 = vmatpush.bf16.msrb.mxu0 %v738_v48 }
  0x33   :  { %484 = vmatpush.bf16.msrb.mxu1 %v746_v49 }
  0x36   :  { %472 = vmatpush.bf16.msrb.mxu0 %v737_v50 }
  0x37   :  { %485 = vmatpush.bf16.msrb.mxu1 %v745_v51 }
  0x3a   :  { %473 = vmatpush.bf16.msrb.mxu0 %v736_v52 }
  0x3b   :  { %486 = vmatpush.bf16.msrb.mxu1 %v744_v53 }
  0x3e   :  { %474 = vmatpush.bf16.msrb.mxu0 %v735_v54 }
  0x3f   :  { %487 = vmatpush.bf16.msrb.mxu1 %v743_v55 }
  0x41   :  { %475 = vmatmul.bf16.vlgmr.msrb.gmra.mxu0 %v121_v58 }
  0x42   :  { %488 = vmatmul.bf16.vlgmr.msrb.gmra.mxu1 %v122_v59 }
  0x9e   :  { %v424_v60 = vpop.f32.mrf.mxu0 }
  0x9f   :  { %v437_v61 = vpop.f32.mrf.mxu1  ;;  %v425_v3 = vadd.f32 %v752_v2, %v424_v60 }
  0xa1   :  { %v438_v6 = vadd.f32 %v437_v61, %v425_v3 }
  0xa6   :  { %v426_v62 = vpop.f32.mrf.mxu0  ;;  %v450_v0 = vpop.f32.mrf.mxu2 }
  0xa7   :  { %v439_v63 = vpop.f32.mrf.mxu1  ;;  %v463_v1 = vpop.f32.mrf.mxu3  ;;  %v451_v7 = vadd.f32 %v450_v0, %v438_v6 }
  0xa9   :  { %v464_v8 = vadd.f32 %v463_v1, %v451_v7 }
  0xae   :  { %v452_v4 = vpop.f32.mrf.mxu2 }
  0xaf   :  { %v465_v5 = vpop.f32.mrf.mxu3 }
  0xbe   :  { %v476_v9 = vpop.f32.mrf.mxu0 }
  0xbf   :  { %v489_v10 = vpop.f32.mrf.mxu1  ;;  %v477_v11 = vadd.f32 %v476_v9, %v464_v8 }
  0xc1   :  { %v490_v12 = vadd.f32 %v489_v10, %v477_v11 }
  0xc3   :  { %494 = vst.msk [vmem:[#allocation2] sm:$0xff] %vm493_vm0, %v490_v12 }
  0xc4   :  { %505 = dma.vmem_to_hbm [thread:$0]  %s501_s13, 128, %s503_s16, [#allocation3]  }
  0xc6   :  { %v478_v13 = vpop.f32.mrf.mxu0 }
  0xc7   :  { %v491_v14 = vpop.f32.mrf.mxu1 }
  0xc8   :  { %777 = dma.done.wait [#allocation3], 128  }
  0xc9   :  { %778 = vsyncadd [#allocation3], 4294967168 }
  0xca   :  { %510 = vsyncpa [#allocation3], 1 }

</bundles_post_ra>
